<compile_context>
chip_gen: v6e
topology: v6e:2x2x1
jax: 0.10.0
libtpu: 0.0.40
codegen_flags: <defaults>
</compile_context>

<pallas_src>
import functools

import jax
import jax.numpy as jnp
from jax.experimental import pallas as pl
from jax.experimental.pallas import tpu as pltpu

HIDDEN = 5          # hidden width of the PyTorch module
LANE = 128          # TPU lane width; pad internal feature dims to multiples of this
NEG_INF = -1e30     # f32 bias for padded logit lanes -> exp() == 0 in the softmax


def _round_up(x, m):
    return ((x + m - 1) // m) * m


def mlp_kernel(x_ref, w1_ref, b1_ref, w2_ref, b2_ref, w3_ref, b3_ref, o_ref):
    out_dim = o_ref.shape[-1]

    # fc1 + relu  (bf16 MXU inputs, f32 accumulation).  x arrives in f32 and is
    # cast on the VPU here (free under the huge compute slack).
    xb = x_ref[...].astype(w1_ref.dtype)
    h1 = jnp.dot(xb, w1_ref[...], preferred_element_type=jnp.float32) + b1_ref[...]
    h1 = jnp.maximum(h1, 0.0).astype(w2_ref.dtype)

    # fc2 + relu
    h2 = jnp.dot(h1, w2_ref[...], preferred_element_type=jnp.float32) + b2_ref[...]
    h2 = jnp.maximum(h2, 0.0).astype(w3_ref.dtype)

    # fc3 + softmax along the feature axis (PyTorch dim=1 for [B, F] input).
    # Padded logit lanes carry a ~-1e30 f32 bias, so exp(.) is exactly 0 there
    # and the denominator only sees the real output_dim lanes.
    logits = jnp.dot(h2, w3_ref[...], preferred_element_type=jnp.float32) + b3_ref[...]
    m = jnp.max(logits, axis=-1, keepdims=True)
    e = jnp.exp(logits - m)
    denom = jnp.sum(e, axis=-1, keepdims=True)
    probs = e / denom                      # exact divide: row sums stay == 1

    # Store only the real lanes: narrow (B, out_dim) HBM writeback, no padded
    # 128-lane f32 slab and no wrapper-side slice pass afterwards.
    o_ref[...] = probs[:, :out_dim]


def prepare_params(params):
    """One-time: pad the tiny weights/biases to lane-friendly widths.

    Weights go to bf16 for the MXU; biases stay f32 (NEG_INF must remain f32).
    Padded K rows / N cols are zero so they contribute nothing.
    """
    w1, b1, w2, b2, w3, b3 = params
    in_dim = w1.shape[0]
    out_dim = w3.shape[1]
    hp = _round_up(HIDDEN, LANE)
    op = _round_up(out_dim, LANE)
    bf16 = jnp.bfloat16

    w1p = jnp.zeros((in_dim, hp), bf16).at[:, :HIDDEN].set(w1.astype(bf16))
    b1p = jnp.zeros((1, hp), jnp.float32).at[:, :HIDDEN].set(b1)
    w2p = jnp.zeros((hp, hp), bf16).at[:HIDDEN, :HIDDEN].set(w2.astype(bf16))
    b2p = jnp.zeros((1, hp), jnp.float32).at[:, :HIDDEN].set(b2)
    w3p = jnp.zeros((hp, op), bf16).at[:HIDDEN, :out_dim].set(w3.astype(bf16))
    b3p = jnp.full((1, op), NEG_INF, jnp.float32).at[:, :out_dim].set(b3)
    return (w1p, b1p, w2p, b2p, w3p, b3p)


@functools.partial(jax.jit, static_argnames=("out_dim", "block_b"))
def mlp_forward(x, padded_params, *, out_dim, block_b=1024):
    """x: [B, input_dim] f32; padded_params from prepare_params()."""
    w1p, b1p, w2p, b2p, w3p, b3p = padded_params
    B, in_dim = x.shape
    hp = w1p.shape[1]
    op = w3p.shape[1]

    # Batch tile: as large as possible (per-step overhead dominates small tiles)
    # but rounded to the sublane multiple when B is small.  grid = cdiv(B, tb):
    # the last partial tile is OOB-masked by Pallas.
    tb = min(block_b, _round_up(B, 8))
    grid = (pl.cdiv(B, tb),)

    resident = lambda i: (0, 0)   # weights stay VMEM-resident across grid steps
    return pl.pallas_call(
        mlp_kernel,
        out_shape=jax.ShapeDtypeStruct((B, out_dim), jnp.float32),
        grid=grid,
        in_specs=[
            pl.BlockSpec((tb, in_dim), lambda i: (i, 0)),   # x: row-tiled, f32
            pl.BlockSpec((in_dim, hp), resident),           # w1
            pl.BlockSpec((1, hp), resident),                # b1
            pl.BlockSpec((hp, hp), resident),               # w2
            pl.BlockSpec((1, hp), resident),                # b2
            pl.BlockSpec((hp, op), resident),               # w3
            pl.BlockSpec((1, op), resident),                # b3 (f32, NEG_INF pads)
        ],
        out_specs=pl.BlockSpec((tb, out_dim), lambda i: (i, 0)),
        compiler_params=pltpu.CompilerParams(
            dimension_semantics=("parallel",)),
    )(x, w1p, b1p, w2p, b2p, w3p, b3p)


def init_params(key, input_dim, output_dim):
    """Deterministic PyTorch-style uniform(-1/sqrt(fan_in), 1/sqrt(fan_in)) init."""
    def linear(key, fan_in, fan_out):
        kw, kb = jax.random.split(key)
        bound = 1.0 / jnp.sqrt(fan_in)
        w = jax.random.uniform(kw, (fan_in, fan_out), jnp.float32, -bound, bound)
        b = jax.random.uniform(kb, (1, fan_out), jnp.float32, -bound, bound)
        return w, b

    k1, k2, k3 = jax.random.split(key, 3)
    w1, b1 = linear(k1, input_dim, HIDDEN)
    w2, b2 = linear(k2, HIDDEN, HIDDEN)
    w3, b3 = linear(k3, HIDDEN, output_dim)
    return (w1, b1, w2, b2, w3, b3)


def mlp_reference(x, params, mirror_bf16=True):
    """Pure-JAX reference. mirror_bf16=True mirrors the kernel's bf16 MXU inputs."""
    w1, b1, w2, b2, w3, b3 = params
    cast = (lambda a: a.astype(jnp.bfloat16)) if mirror_bf16 else (lambda a: a)
    h1 = jnp.maximum(jnp.dot(cast(x), cast(w1), preferred_element_type=jnp.float32) + b1, 0.0)
    h2 = jnp.maximum(jnp.dot(cast(h1), cast(w2), preferred_element_type=jnp.float32) + b2, 0.0)
    logits = jnp.dot(cast(h2), cast(w3), preferred_element_type=jnp.float32) + b3
    return jax.nn.softmax(logits, axis=1)


if __name__ == "__main__":
    key = jax.random.PRNGKey(0)
    kx, kp = jax.random.split(key)

    batch, input_dim, output_dim = 8, 16, 4
    x = jax.random.normal(kx, (batch, input_dim), jnp.float32)
    params = init_params(kp, input_dim, output_dim)

    padded_params = prepare_params(params)          # one-time, outside hot path
    y = mlp_forward(x, padded_params, out_dim=output_dim)
    jax.block_until_ready(y)

    assert y.shape == (batch, output_dim)
    # Tight check vs. a reference that mirrors the kernel's bf16 matmul inputs.
    y_ref_bf16 = mlp_reference(x, params, mirror_bf16=True)
    assert jnp.allclose(y, y_ref_bf16, atol=2e-3, rtol=1e-2), (
        float(jnp.max(jnp.abs(y - y_ref_bf16))))
    # Loose check vs. the pure-f32 reference (bf16 weight quantization error).
    y_ref_f32 = mlp_reference(x, params, mirror_bf16=False)
    assert jnp.allclose(y, y_ref_f32, atol=3e-2), (
        float(jnp.max(jnp.abs(y - y_ref_f32))))
    # Softmax rows sum to 1 (exact divide; padded lanes contribute exactly 0).
    assert jnp.allclose(jnp.sum(y, axis=1), jnp.ones((batch,)), atol=1e-3), (
        float(jnp.max(jnp.abs(jnp.sum(y, axis=1) - 1.0))))

    print("KERNEL_OK")
</pallas_src>

<mosaic_0001>
module attributes {stable_mosaic.version = 11 : i64} {
  func.func @mlp_kernel(%arg0: i32, %arg1: memref<8x16xf32, #tpu.memory_space<vmem>>, %arg2: memref<16x128xbf16, #tpu.memory_space<vmem>>, %arg3: memref<1x128xf32, #tpu.memory_space<vmem>>, %arg4: memref<128x128xbf16, #tpu.memory_space<vmem>>, %arg5: memref<1x128xf32, #tpu.memory_space<vmem>>, %arg6: memref<128x128xbf16, #tpu.memory_space<vmem>>, %arg7: memref<1x128xf32, #tpu.memory_space<vmem>>, %arg8: memref<8x4xf32, #tpu.memory_space<vmem>>) attributes {dimension_semantics = [#tpu.dimension_semantics<parallel>], iteration_bounds = array<i64: 1>, scalar_prefetch = 0 : i64, scratch_operands = 0 : i64, tpu.core_type = #tpu.core_type<tc>, window_params = [{transform_indices = @transform_0, window_bounds = array<i64: 8, 16>}, {pipeline_mode = #tpu.pipeline_mode<synchronous>, transform_indices = @transform_1, window_bounds = array<i64: 16, 128>}, {pipeline_mode = #tpu.pipeline_mode<synchronous>, transform_indices = @transform_2, window_bounds = array<i64: 1, 128>}, {pipeline_mode = #tpu.pipeline_mode<synchronous>, transform_indices = @transform_3, window_bounds = array<i64: 128, 128>}, {pipeline_mode = #tpu.pipeline_mode<synchronous>, transform_indices = @transform_4, window_bounds = array<i64: 1, 128>}, {pipeline_mode = #tpu.pipeline_mode<synchronous>, transform_indices = @transform_5, window_bounds = array<i64: 128, 128>}, {pipeline_mode = #tpu.pipeline_mode<synchronous>, transform_indices = @transform_6, window_bounds = array<i64: 1, 128>}, {transform_indices = @transform_7, window_bounds = array<i64: 8, 4>}]} {
    %c0 = arith.constant 0 : index
    %c0_0 = arith.constant 0 : index
    %0 = vector.load %arg1[%c0, %c0_0] : memref<8x16xf32, #tpu.memory_space<vmem>>, vector<8x16xf32>
    %1 = arith.truncf %0 : vector<8x16xf32> to vector<8x16xbf16>
    %c0_1 = arith.constant 0 : index
    %c0_2 = arith.constant 0 : index
    %2 = vector.load %arg2[%c0_1, %c0_2] : memref<16x128xbf16, #tpu.memory_space<vmem>>, vector<16x128xbf16>
    %cst = arith.constant dense<0.000000e+00> : vector<8x128xf32>
    %3 = tpu.matmul %1, %2, %cst {dimension_numbers = #tpu.dot_dimension_numbers<[1], [0], [0], [1], [0, 0, 1, 1], [], []>} : vector<8x16xbf16>, vector<16x128xbf16>, vector<8x128xf32> -> vector<8x128xf32>
    %c0_3 = arith.constant 0 : index
    %c0_4 = arith.constant 0 : index
    %4 = vector.load %arg3[%c0_3, %c0_4] : memref<1x128xf32, #tpu.memory_space<vmem>>, vector<1x128xf32>
    %5 = vector.broadcast %4 : vector<1x128xf32> to vector<8x128xf32>
    %6 = arith.addf %3, %5 : vector<8x128xf32>
    %cst_5 = arith.constant 0.000000e+00 : f32
    %7 = vector.broadcast %cst_5 : f32 to vector<8x128xf32>
    %8 = arith.maximumf %6, %7 : vector<8x128xf32>
    %9 = arith.truncf %8 : vector<8x128xf32> to vector<8x128xbf16>
    %c0_6 = arith.constant 0 : index
    %c0_7 = arith.constant 0 : index
    %10 = vector.load %arg4[%c0_6, %c0_7] : memref<128x128xbf16, #tpu.memory_space<vmem>>, vector<128x128xbf16>
    %cst_8 = arith.constant dense<0.000000e+00> : vector<8x128xf32>
    %11 = tpu.matmul %9, %10, %cst_8 {dimension_numbers = #tpu.dot_dimension_numbers<[1], [0], [0], [1], [0, 0, 1, 1], [], []>} : vector<8x128xbf16>, vector<128x128xbf16>, vector<8x128xf32> -> vector<8x128xf32>
    %c0_9 = arith.constant 0 : index
    %c0_10 = arith.constant 0 : index
    %12 = vector.load %arg5[%c0_9, %c0_10] : memref<1x128xf32, #tpu.memory_space<vmem>>, vector<1x128xf32>
    %13 = vector.broadcast %12 : vector<1x128xf32> to vector<8x128xf32>
    %14 = arith.addf %11, %13 : vector<8x128xf32>
    %cst_11 = arith.constant 0.000000e+00 : f32
    %15 = vector.broadcast %cst_11 : f32 to vector<8x128xf32>
    %16 = arith.maximumf %14, %15 : vector<8x128xf32>
    %17 = arith.truncf %16 : vector<8x128xf32> to vector<8x128xbf16>
    %c0_12 = arith.constant 0 : index
    %c0_13 = arith.constant 0 : index
    %18 = vector.load %arg6[%c0_12, %c0_13] : memref<128x128xbf16, #tpu.memory_space<vmem>>, vector<128x128xbf16>
    %cst_14 = arith.constant dense<0.000000e+00> : vector<8x128xf32>
    %19 = tpu.matmul %17, %18, %cst_14 {dimension_numbers = #tpu.dot_dimension_numbers<[1], [0], [0], [1], [0, 0, 1, 1], [], []>} : vector<8x128xbf16>, vector<128x128xbf16>, vector<8x128xf32> -> vector<8x128xf32>
    %c0_15 = arith.constant 0 : index
    %c0_16 = arith.constant 0 : index
    %20 = vector.load %arg7[%c0_15, %c0_16] : memref<1x128xf32, #tpu.memory_space<vmem>>, vector<1x128xf32>
    %21 = vector.broadcast %20 : vector<1x128xf32> to vector<8x128xf32>
    %22 = arith.addf %19, %21 : vector<8x128xf32>
    %cst_17 = arith.constant dense<0xFF800000> : vector<8xf32>
    %23 = vector.multi_reduction <maximumf>, %22, %cst_17 [1] : vector<8x128xf32> to vector<8xf32>
    %24 = vector.shape_cast %23 : vector<8xf32> to vector<8x1xf32>
    %25 = vector.broadcast %24 : vector<8x1xf32> to vector<8x128xf32>
    %26 = arith.subf %22, %25 : vector<8x128xf32>
    %27 = math.exp %26 : vector<8x128xf32>
    %cst_18 = arith.constant dense<0.000000e+00> : vector<8xf32>
    %28 = vector.multi_reduction <add>, %27, %cst_18 [1] : vector<8x128xf32> to vector<8xf32>
    %29 = vector.shape_cast %28 : vector<8xf32> to vector<8x1xf32>
    %30 = vector.broadcast %29 : vector<8x1xf32> to vector<8x128xf32>
    %31 = arith.divf %27, %30 : vector<8x128xf32>
    %32 = vector.extract_strided_slice %31 {offsets = [0, 0], sizes = [8, 4], strides = [1, 1]} : vector<8x128xf32> to vector<8x4xf32>
    %c0_19 = arith.constant 0 : index
    %c0_20 = arith.constant 0 : index
    %33 = vector.load %arg8[%c0_19, %c0_20] : memref<8x4xf32, #tpu.memory_space<vmem>>, vector<8x4xf32>
    tpu.vector_store %arg8[%c0_19, %c0_20], %32 {strides = array<i32>} : memref<8x4xf32, #tpu.memory_space<vmem>>, vector<8x4xf32>,
    return
  }
  func.func @transform_0(%arg0: i32) -> (i32, i32) {
    %c0_i32 = arith.constant 0 : i32
    %c0_i32_0 = arith.constant 0 : i32
    return %arg0, %c0_i32 : i32, i32
  }
  func.func @transform_1(%arg0: i32) -> (i32, i32) {
    %c0_i32 = arith.constant 0 : i32
    %c0_i32_0 = arith.constant 0 : i32
    %c0_i32_1 = arith.constant 0 : i32
    return %c0_i32, %c0_i32_0 : i32, i32
  }
  func.func @transform_2(%arg0: i32) -> (i32, i32) {
    %c0_i32 = arith.constant 0 : i32
    %c0_i32_0 = arith.constant 0 : i32
    %c0_i32_1 = arith.constant 0 : i32
    return %c0_i32, %c0_i32_0 : i32, i32
  }
  func.func @transform_3(%arg0: i32) -> (i32, i32) {
    %c0_i32 = arith.constant 0 : i32
    %c0_i32_0 = arith.constant 0 : i32
    %c0_i32_1 = arith.constant 0 : i32
    return %c0_i32, %c0_i32_0 : i32, i32
  }
  func.func @transform_4(%arg0: i32) -> (i32, i32) {
    %c0_i32 = arith.constant 0 : i32
    %c0_i32_0 = arith.constant 0 : i32
    %c0_i32_1 = arith.constant 0 : i32
    return %c0_i32, %c0_i32_0 : i32, i32
  }
  func.func @transform_5(%arg0: i32) -> (i32, i32) {
    %c0_i32 = arith.constant 0 : i32
    %c0_i32_0 = arith.constant 0 : i32
    %c0_i32_1 = arith.constant 0 : i32
    return %c0_i32, %c0_i32_0 : i32, i32
  }
  func.func @transform_6(%arg0: i32) -> (i32, i32) {
    %c0_i32 = arith.constant 0 : i32
    %c0_i32_0 = arith.constant 0 : i32
    %c0_i32_1 = arith.constant 0 : i32
    return %c0_i32, %c0_i32_0 : i32, i32
  }
  func.func @transform_7(%arg0: i32) -> (i32, i32) {
    %c0_i32 = arith.constant 0 : i32
    %c0_i32_0 = arith.constant 0 : i32
    return %arg0, %c0_i32 : i32, i32
  }
}

</mosaic_0001>

<bundles_post_ra>
// kernel: mlp_forward.1
= control target key start
LH: loop header
LB: loop body
LE: loop exit
PB: predicated region body
PF: predicated region fallthrough
CT: control target
= control target key end

     0   :  { %12 = vsyncpa [#allocation3], 0  ;;  %s688_s0 = inlined_call_operand.hbm [shape: f32[8,16], index: 0, kind: input, shape index: {}]   ;;  %s689_s1 = inlined_call_operand.hbm [shape: bf16[16,128], index: 1, kind: input, shape index: {}]   ;;  %s690_s2 = inlined_call_operand.vmem [shape: f32[1,128], index: 2, kind: input, shape index: {}]   ;;  %s691_s3 = inlined_call_operand.hbm [shape: bf16[128,128], index: 3, kind: input, shape index: {}]   ;;  %s692_s4 = inlined_call_operand.vmem [shape: f32[1,128], index: 4, kind: input, shape index: {}]   ;;  %s693_s5 = inlined_call_operand.hbm [shape: bf16[128,128], index: 5, kind: input, shape index: {}]   ;;  %s694_s6 = inlined_call_operand.vmem [shape: f32[1,128], index: 6, kind: input, shape index: {}]   ;;  %s695_s7 = inlined_call_operand.vmem [shape: f32[8,4], index: 7, kind: output, shape index: {}]  }
   0x1   :  { %13 = vsyncpa [#allocation5], 0 }
   0x2   :  { %14 = vsyncpa [#allocation8], 0  ;;  %s587_s24 = smov [#allocation4]  }
   0x3   :  { %s30_s25 = sshll.u32 %s587_s24, 4  ;;  %s31_s25 = int_to_ptr.vmem [resolvable:$true] %s30_s25 }
   0x4   :  { %s509_s26 = scalar_lea.vmem %s31_s25, 128  ;;  %p514_p1 = scmp.lt.s32.totalorder %s31_s25, %s31_s25 }
   0x5   :  { %p510_p0 = scmp.ne.s32.totalorder %s31_s25, %s509_s26  ;;  %p515_p2 = scmp.lt.s32.totalorder %s509_s26, %s509_s26 }
   0x7   :  { %p516_p3 = por %p515_p2, %p514_p1 }
   0x9   :  { %p517_p4 = pnand %p516_p3, %p510_p0 }
   0xb   :  { %520 = shalt.err (!%p517_p4)
}
   0xc   :  { %s588_s27 = smov 64   ;;  %s589_s28 = smov 4  }
   0xd   :  { %36 = dma.hbm_to_vmem [thread:$0]  %s689_s1, 128, %s31_s25, [#allocation5], %s588_s27, %s588_s27, %s589_s28  }
   0xe   :  { %s590_s8 = smov [#allocation2]   ;;  %s591_s10 = smov [#allocation6]  }
   0xf   :  { %s21_s9 = sshll.u32 %s590_s8, 4  ;;  %s44_s11 = sshll.u32 %s591_s10, 4  ;;  %s22_s9 = int_to_ptr.vmem [resolvable:$true] %s21_s9  ;;  %s45_s11 = int_to_ptr.vmem [resolvable:$true] %s44_s11 }
  0x10   :  { %s529_s12 = scalar_lea.vmem %s22_s9, 128  ;;  %p534_p6 = scmp.lt.s32.totalorder %s22_s9, %s22_s9 }
  0x11   :  { %p530_p5 = scmp.ne.s32.totalorder %s22_s9, %s529_s12  ;;  %p535_p7 = scmp.lt.s32.totalorder %s529_s12, %s529_s12 }
  0x13   :  { %p536_p8 = por %p535_p7, %p534_p6 }
  0x15   :  { %p537_p9 = pnand %p536_p8, %p530_p5 }
  0x17   :  { %540 = shalt.err (!%p537_p9)
}
  0x18   :  { %24 = dma.hbm_to_vmem [thread:$0]  %s688_s0, 128, %s22_s9, [#allocation3]  }
  0x19   :  { %s549_s15 = scalar_lea.vmem %s45_s11, 1024  ;;  %p554_p11 = scmp.lt.s32.totalorder %s45_s11, %s45_s11 }
  0x1a   :  { %p550_p10 = scmp.ne.s32.totalorder %s45_s11, %s549_s15  ;;  %p555_p12 = scmp.lt.s32.totalorder %s549_s15, %s549_s15 }
  0x1c   :  { %p556_p13 = por %p555_p12, %p554_p11 }
  0x1e   :  { %p557_p0 = pnand %p556_p13, %p550_p10 }
  0x20   :  { %560 = shalt.err (!%p557_p0)
}
  0x21   :  { %50 = dma.hbm_to_vmem [thread:$0]  %s691_s3, 1024, %s45_s11, [#allocation5], %s588_s27, %s588_s27, %s589_s28  }
  0x22   :  { %s592_s17 = smov [#allocation7]  }
  0x23   :  { %s58_s18 = sshll.u32 %s592_s17, 4  ;;  %s59_s18 = int_to_ptr.vmem [resolvable:$true] %s58_s18 }
  0x24   :  { %s569_s19 = scalar_lea.vmem %s59_s18, 1024  ;;  %p574_p2 = scmp.lt.s32.totalorder %s59_s18, %s59_s18 }
  0x25   :  { %p570_p1 = scmp.ne.s32.totalorder %s59_s18, %s569_s19  ;;  %p575_p3 = scmp.lt.s32.totalorder %s569_s19, %s569_s19 }
  0x27   :  { %p576_p4 = por %p575_p3, %p574_p2 }
  0x29   :  { %p577_p5 = pnand %p576_p4, %p570_p1 }
  0x2b   :  { %580 = shalt.err (!%p577_p5)
}
  0x2c   :  { %64 = dma.hbm_to_vmem [thread:$0]  %s693_s5, 1024, %s59_s18, [#allocation8], %s588_s27, %s588_s27, %s589_s28  }
  0x2d   :  { %581 = dma.done.wait [#allocation3], 128  }
  0x2e   :  { %582 = vsyncadd [#allocation3], 4294967168 }
  0x2f   :  { %583 = dma.done.wait [#allocation5], 1152  }
  0x30   :  { %584 = vsyncadd [#allocation5], 4294966144 }
  0x31   :  { %585 = dma.done.wait [#allocation8], 1024  }
  0x32   :  { %586 = vsyncadd [#allocation8], 4294966272  ;;  %v593_v0 = vmov 0.0   ;;  %vm594_vm0 = vmmov 0   ;;  %v480_v1 = vld [vmem:[#allocation4] sm:$0xff]   ;;  %v80_v2 = vld [vmem:[#allocation2] sm:$0xff] }
  0x33   :  { %426 = vmatprep.subr.bf16.mxu0 %v593_v0  ;;  %428 = vmatprep.mubr.msk.bf16.mxu0 %vm594_vm0, %v593_v0  ;;  %v81_v3 = vpack.c.bf16 %v80_v2, %v80_v2  ;;  %vm97_vm1 = vcmask 130048   ;;  %v481_v4 = vld [vmem:[#allocation6 + $0x38] sm:$0xff]   ;;  %v482_v5 = vld [vmem:[#allocation6 + $0x30] sm:$0xff]   ;;  %v483_v6 = vld [vmem:[#allocation6 + $0x28] sm:$0xff]   ;;  %vm376_vm2 = vcmask 31744  }
  0x34   :  { %432 = vmatprep.subr.bf16.mxu1 %v593_v0  ;;  %448 = vmatprep.mubr.msk.bf16.mxu1 %vm594_vm0, %v593_v0  ;;  %v484_v7 = vld [vmem:[#allocation6 + $0x20] sm:$0xff]   ;;  %v485_v8 = vld [vmem:[#allocation6 + $0x18] sm:$0xff]   ;;  %v486_v9 = vld [vmem:[#allocation6 + $0x10] sm:$0xff]  }
  0x35   :  { %427 = vmatpush3.bf16.msra.mxu0 %v480_v1  ;;  %433 = vmatpush3.bf16.msra.mxu1 %v481_v4  ;;  %v487_v10 = vld [vmem:[#allocation6 + $0x8] sm:$0xff]   ;;  %v488_v11 = vld [vmem:[#allocation6] sm:$0xff]   ;;  %v489_v12 = vld [vmem:[#allocation7 + $0x38] sm:$0xff]  }
  0x36   :  { %452 = vmatprep.subr.bf16.mxu0 %v593_v0  ;;  %434 = vmatprep.subr.bf16.mxu1 %v593_v0  ;;  %v490_v13 = vld [vmem:[#allocation7 + $0x30] sm:$0xff]   ;;  %v491_v14 = vld [vmem:[#allocation7 + $0x28] sm:$0xff]   ;;  %v492_v15 = vld [vmem:[#allocation7 + $0x20] sm:$0xff]  }
  0x37   :  { %v493_v16 = vld [vmem:[#allocation7 + $0x18] sm:$0xff]   ;;  %v494_v17 = vld [vmem:[#allocation7 + $0x10] sm:$0xff]   ;;  %v495_v26 = vld [vmem:[#allocation7 + $0x8] sm:$0xff]  }
  0x38   :  { %429 = vmatmul.mubr.msk.bf16.vlgmr.msra.gmra.mxu0 %vm97_vm1, %v81_v3  ;;  %v385_v18 = vld [vmem:[%s690_s2] ss:$0 sm:$0xff]  ;;  %v496_v27 = vld [vmem:[#allocation7] sm:$0xff]  }
  0x39   :  { %468 = vmatprep.mubr.msk.bf16.mxu0 %vm594_vm0, %v593_v0  ;;  %435 = vmatpush3.bf16.msra.mxu1 %v482_v5  ;;  %v388_v28 = vld [vmem:[%s692_s4] ss:$0 sm:$0xff] }
  0x3a   :  { %436 = vmatprep.subr.bf16.mxu1 %v593_v0  ;;  %453 = vmatpush3.bf16.msra.mxu0 %v489_v12  ;;  %v397_v36 = vld [vmem:[%s694_s6] ss:$0 sm:$0xff] }
  0x3b   :  { %454 = vmatprep.subr.bf16.mxu0 %v593_v0 }
  0x3d   :  { %437 = vmatpush3.bf16.msra.mxu1 %v483_v6 }
  0x3e   :  { %438 = vmatprep.subr.bf16.mxu1 %v593_v0  ;;  %455 = vmatpush3.bf16.msra.mxu0 %v490_v13 }
  0x3f   :  { %456 = vmatprep.subr.bf16.mxu0 %v593_v0 }
  0x41   :  { %439 = vmatpush3.bf16.msra.mxu1 %v484_v7 }
  0x42   :  { %440 = vmatprep.subr.bf16.mxu1 %v593_v0  ;;  %457 = vmatpush3.bf16.msra.mxu0 %v491_v14 }
  0x43   :  { %458 = vmatprep.subr.bf16.mxu0 %v593_v0 }
  0x45   :  { %441 = vmatpush3.bf16.msra.mxu1 %v485_v8 }
  0x46   :  { %442 = vmatprep.subr.bf16.mxu1 %v593_v0  ;;  %459 = vmatpush3.bf16.msra.mxu0 %v492_v15 }
  0x47   :  { %460 = vmatprep.subr.bf16.mxu0 %v593_v0 }
  0x49   :  { %443 = vmatpush3.bf16.msra.mxu1 %v486_v9 }
  0x4a   :  { %444 = vmatprep.subr.bf16.mxu1 %v593_v0  ;;  %461 = vmatpush3.bf16.msra.mxu0 %v493_v16 }
  0x4b   :  { %462 = vmatprep.subr.bf16.mxu0 %v593_v0 }
  0x4d   :  { %445 = vmatpush3.bf16.msra.mxu1 %v487_v10 }
  0x4e   :  { %446 = vmatprep.subr.bf16.mxu1 %v593_v0  ;;  %463 = vmatpush3.bf16.msra.mxu0 %v494_v17 }
  0x4f   :  { %464 = vmatprep.subr.bf16.mxu0 %v593_v0 }
  0x51   :  { %447 = vmatpush3.bf16.msra.mxu1 %v488_v11 }
  0x52   :  { %465 = vmatpush3.bf16.msra.mxu0 %v495_v26 }
  0x53   :  { %466 = vmatprep.subr.bf16.mxu0 %v593_v0 }
  0x56   :  { %467 = vmatpush3.bf16.msra.mxu0 %v496_v27 }
  0xf8   :  { %v135_v19 = vpop.f32.mrf.mxu0 }
  0xf9   :  { %v136_v20 = vadd.f32 %v385_v18, %v135_v19 }
  0xfa   :  { %v430_v21 = vpop.f32.mrf.mxu0 }
  0xfb   :  { %v141_v22 = vmax.f32 %v136_v20, 0.0 }
  0xfc   :  { %v138_v23 = vpop.f32.mrf.mxu0 }
  0xfd   :  { %v142_v24 = vpack.c.bf16 %v141_v22, %v141_v22 }
  0xfe   :  { %v431_v25 = vpop.f32.mrf.mxu0 }
  0xff   :  { %449 = vmatmul.mubr.bf16.vlgmr.msra.gmra.mxu1 %v142_v24 }
 0x1bf   :  { %v248_v29 = vpop.f32.mrf.mxu1 }
 0x1c0   :  { %v249_v30 = vadd.f32 %v388_v28, %v248_v29 }
 0x1c1   :  { %v450_v31 = vpop.f32.mrf.mxu1 }
 0x1c2   :  { %v254_v32 = vmax.f32 %v249_v30, 0.0 }
 0x1c3   :  { %v251_v33 = vpop.f32.mrf.mxu1 }
 0x1c4   :  { %v255_v34 = vpack.c.bf16 %v254_v32, %v254_v32 }
 0x1c5   :  { %v451_v35 = vpop.f32.mrf.mxu1 }
 0x1c6   :  { %469 = vmatmul.mubr.bf16.vlgmr.msra.gmra.mxu0 %v255_v34 }
 0x286   :  { %v361_v37 = vpop.f32.mrf.mxu0 }
 0x287   :  { %v362_v38 = vadd.f32 %v397_v36, %v361_v37 }
 0x288   :  { %v470_v39 = vpop.f32.mrf.mxu0 }
 0x289   :  { %367 = vmax.xlane.f32.xlu0 %v362_v38 }
 0x28a   :  { %v364_v40 = vpop.f32.mrf.mxu0 }
 0x28c   :  { %v471_v41 = vpop.f32.mrf.mxu0 }
 0x312   :  { %v368_v42 = vpop.xlane.xlu0 %367 }
 0x313   :  { %v369_v43 = vsub.f32 %v362_v38, %v368_v42 }
 0x315   :  { %v370_v44 = vmul.f32 1.442695, %v369_v43 }
 0x317   :  { %497 = vpow2.f32 %v370_v44 }
 0x324   :  { %v498_v45 = vpop.eup %497 }
 0x325   :  { %372 = vadd.xlane.f32.xlu0 %v498_v45 }
 0x3ae   :  { %v373_v46 = vpop.xlane.xlu0 %372 }
 0x3af   :  { %499 = vrcp.f32 %v373_v46 }
 0x3bc   :  { %v500_v47 = vpop.eup %499 }
 0x3bd   :  { %v375_v48 = vmul.f32 %v500_v47, %v498_v45 }
 0x3bf   :  { %377 = vst.msk [vmem:[%s695_s7] sm:$0xff] %vm376_vm2, %v375_v48 }
 0x3c0   :  { %382 = vsyncpa [#allocation3], 1 }
 0x3c1   :  { %383 = vsyncpa [#allocation5], 1 }
 0x3c2   :  { %384 = vsyncpa [#allocation8], 1 }

</bundles_post_ra>
